<compile_context>
chip_gen: v7x
topology: tpu7x:2x2x1
jax: 0.10.0
libtpu: 0.0.40
codegen_flags: <defaults>
</compile_context>

<pallas_src>
import functools

import jax
import jax.numpy as jnp
from jax.experimental import pallas as pl
from jax.experimental.pallas import tpu as pltpu

_LANES = 128


def _sublanes_for(dtype) -> int:
    # 8 sublanes for 32-bit, 16 for 16-bit, 32 for 8-bit packed dtypes.
    itemsize = jnp.dtype(dtype).itemsize
    return max(8, 32 // max(itemsize, 1))


def _tpu_generation() -> str:
    try:
        kind = jax.devices()[0].device_kind.lower()
    except Exception:  # pragma: no cover - defensive; assume TPU backend
        return "unknown"
    if "v5" in kind:
        return "v5e"
    if "v6" in kind:
        return "v6e"
    if "v7" in kind:
        return "v7x"
    return "unknown"


# (target I/O bytes per block, scoped VMEM limit) per generation.
#  - v5e (~0.8 TB/s HBM): 2 MiB blocks already amortize the ~0.35 us step cost.
#  - v6e (128 MiB VMEM, ~1.4 TB/s): grow to ~6 MiB blocks, raise scoped limit.
#  - v7x (64 MiB VMEM, ~3.2 TB/s per TC): ~4 MiB blocks, conservative limit.
_GEN_BLOCK_CFG = {
    "v5e": (2 * 1024 * 1024, 32 * 1024 * 1024),
    "v6e": (6 * 1024 * 1024, 64 * 1024 * 1024),
    "v7x": (4 * 1024 * 1024, 48 * 1024 * 1024),
    "unknown": (4 * 1024 * 1024, 48 * 1024 * 1024),
}


def _sine_kernel(x_ref, o_ref, *, w0: float):
    # Single multiply + sin; compute in f32, store in the output dtype.
    x = x_ref[...].astype(jnp.float32)
    o_ref[...] = jnp.sin(w0 * x).astype(o_ref.dtype)


@functools.partial(jax.jit, static_argnames=("w0",))
def sine(x, w0: float = 30.0):
    """Elementwise sin(w0 * x) via a Pallas TPU kernel. Works for any shape."""
    orig_shape = x.shape
    dtype = x.dtype
    n = x.size
    if n == 0:
        return x

    flat = x.reshape(-1)  # metadata-only for a dense row-major array
    n_main = (n // _LANES) * _LANES
    n_tail = n - n_main

    # Whole input smaller than one 128-lane row: no kernel needed.
    if n_main == 0:
        return jnp.sin(w0 * flat.astype(jnp.float32)).astype(dtype).reshape(orig_shape)

    rows = n_main // _LANES
    x2d = flat[:n_main].reshape(rows, _LANES)  # no-op slice when n_tail == 0

    sublanes = _sublanes_for(dtype)
    itemsize = jnp.dtype(dtype).itemsize
    gen = _tpu_generation()
    target_block_bytes, vmem_limit = _GEN_BLOCK_CFG[gen]

    # VMEM budget per row of a block: double-buffered input + output in the I/O
    # dtype, plus ~3 whole-tile f32 intermediates inside the kernel body.
    per_row_vmem = _LANES * (4 * itemsize + 3 * 4)
    budget = vmem_limit - 8 * 1024 * 1024  # margin for Mosaic internal scratch
    max_rows_vmem = max(sublanes, (budget // per_row_vmem) // sublanes * sublanes)

    # Target rows from the generation-specific per-block I/O byte target.
    target_rows = max(
        sublanes, (target_block_bytes // (_LANES * itemsize)) // sublanes * sublanes
    )

    # Ensure >= 2 grid steps when everything would otherwise fit in one block,
    # so the "parallel" grid axis can be sharded across both v7x TensorCores.
    half_rows = pl.cdiv(pl.cdiv(rows, 2), sublanes) * sublanes

    tile_rows = max(sublanes, min(target_rows, max_rows_vmem, half_rows))
    grid = (pl.cdiv(rows, tile_rows),)

    kernel = functools.partial(_sine_kernel, w0=float(w0))

    out2d = pl.pallas_call(
        kernel,
        out_shape=jax.ShapeDtypeStruct((rows, _LANES), dtype),
        grid=grid,
        in_specs=[pl.BlockSpec((tile_rows, _LANES), lambda i: (i, 0))],
        out_specs=pl.BlockSpec((tile_rows, _LANES), lambda i: (i, 0)),
        compiler_params=pltpu.CompilerParams(
            dimension_semantics=("parallel",),
            vmem_limit_bytes=vmem_limit,
        ),
    )(x2d)

    if n_tail == 0:
        return out2d.reshape(orig_shape)

    # <128-element tail: compute directly (avoids pad + slice-back HBM passes).
    tail = jnp.sin(w0 * flat[n_main:].astype(jnp.float32)).astype(dtype)
    return jnp.concatenate([out2d.reshape(-1), tail]).reshape(orig_shape)


if __name__ == "__main__":
    key = jax.random.PRNGKey(0)
    k0, k1, k2, k3, k4 = jax.random.split(key, 5)

    # NCHW input, small shapes: batch=2, channels=4, spatial=16x16 (aligned path).
    x = jax.random.normal(k0, (2, 4, 16, 16), dtype=jnp.float32)
    y = sine(x, w0=30.0)
    jax.block_until_ready(y)
    assert y.shape == x.shape and y.dtype == x.dtype
    assert jnp.allclose(y, jnp.sin(30.0 * x), atol=1e-5, rtol=1e-5)

    # 128-aligned but rows (=15) not a multiple of 8: masked ragged last block.
    x1 = jax.random.normal(k1, (3, 5, 128), dtype=jnp.float32)
    y1 = sine(x1, w0=30.0)
    jax.block_until_ready(y1)
    assert jnp.allclose(y1, jnp.sin(30.0 * x1), atol=1e-5, rtol=1e-5)

    # Not 128-divisible: kernel on the aligned prefix + direct tail compute.
    x2 = jax.random.normal(k2, (4, 100), dtype=jnp.float32)
    y2 = sine(x2, w0=30.0)
    jax.block_until_ready(y2)
    assert jnp.allclose(y2, jnp.sin(30.0 * x2), atol=1e-5, rtol=1e-5)

    # Smaller than one 128-lane row: pure tail path.
    x3 = jax.random.normal(k3, (3, 5, 7), dtype=jnp.float32)
    y3 = sine(x3, w0=30.0)
    jax.block_until_ready(y3)
    assert jnp.allclose(y3, jnp.sin(30.0 * x3), atol=1e-5, rtol=1e-5)

    # bf16 I/O (f32 compute inside the kernel).
    x4 = jax.random.normal(k4, (2, 8, 128), dtype=jnp.bfloat16)
    y4 = sine(x4, w0=30.0)
    jax.block_until_ready(y4)
    ref4 = jnp.sin(30.0 * x4.astype(jnp.float32)).astype(jnp.bfloat16)
    assert y4.dtype == jnp.bfloat16
    assert jnp.allclose(y4.astype(jnp.float32), ref4.astype(jnp.float32), atol=2e-2)

    print("KERNEL_OK")
</pallas_src>

<mosaic_0001>
module attributes {stable_mosaic.version = 11 : i64} {
  func.func @_sine_kernel(%arg0: i32, %arg1: memref<8x128xf32, #tpu.memory_space<vmem>>, %arg2: memref<8x128xf32, #tpu.memory_space<vmem>>) attributes {dimension_semantics = [#tpu.dimension_semantics<parallel>], iteration_bounds = array<i64: 2>, scalar_prefetch = 0 : i64, scratch_operands = 0 : i64, tpu.core_type = #tpu.core_type<tc>, window_params = [{transform_indices = @transform_0, window_bounds = array<i64: 8, 128>}, {transform_indices = @transform_1, window_bounds = array<i64: 8, 128>}]} {
    %c0 = arith.constant 0 : index
    %c0_0 = arith.constant 0 : index
    %0 = vector.load %arg1[%c0, %c0_0] : memref<8x128xf32, #tpu.memory_space<vmem>>, vector<8x128xf32>
    %cst = arith.constant 3.000000e+01 : f32
    %1 = vector.broadcast %cst : f32 to vector<8x128xf32>
    %2 = arith.mulf %1, %0 : vector<8x128xf32>
    %3 = math.sin %2 : vector<8x128xf32>
    %c0_1 = arith.constant 0 : index
    %c0_2 = arith.constant 0 : index
    %4 = vector.load %arg2[%c0_1, %c0_2] : memref<8x128xf32, #tpu.memory_space<vmem>>, vector<8x128xf32>
    tpu.vector_store %arg2[%c0_1, %c0_2], %3 {strides = array<i32>} : memref<8x128xf32, #tpu.memory_space<vmem>>, vector<8x128xf32>,
    return
  }
  func.func @transform_0(%arg0: i32) -> (i32, i32) {
    %c0_i32 = arith.constant 0 : i32
    %c0_i32_0 = arith.constant 0 : i32
    return %arg0, %c0_i32 : i32, i32
  }
  func.func @transform_1(%arg0: i32) -> (i32, i32) {
    %c0_i32 = arith.constant 0 : i32
    %c0_i32_0 = arith.constant 0 : i32
    return %arg0, %c0_i32 : i32, i32
  }
}

</mosaic_0001>

<bundles_post_ra>
// kernel: sine.1
= control target key start
LH: loop header
LB: loop body
LE: loop exit
PB: predicated region body
PF: predicated region fallthrough
CT: control target
= control target key end

     0   :  { %s331_s6 = smov 0   ;;  %s376_s0 = inlined_call_operand.vmem [shape: f32[16,128], index: 0, kind: input, shape index: {}]   ;;  %s377_s1 = inlined_call_operand.vmem [shape: f32[16,128], index: 1, kind: output, shape index: {}]  }
   0x1 LB: > { %s272_s7 = sadd.s32 4294967295, %s313_s6   ;;  %p276_p0 = scmp.ge.s32.totalorder %s313_s6, 1  ;;  %s313_s6 = sphi %s331_s6, %s11_s6  }
   0x2   : > { %p86_p1 = scmp.lt.s32.totalorder %s313_s6, 3 }
   0x4   : > { %p87_p2 = pnand %p276_p0, %p86_p1 }
   0x5   : > { %p104_p3 = scmp.lt.s32.totalorder (!%p87_p2), %s272_s7, 1  ;;  %v315_v13 = vmov (!%p87_p2), 683565275   ;;  %v316_v15 = vmov (!%p87_p2), 2475754826  }
   0x6   : > { %90 = sbr.rel (%p87_p2) target bundleno = 100 (0x64), region = 24  ;;  %v317_v17 = vmov (!%p87_p2), 2131351028   ;;  %v318_v19 = vmov (!%p87_p2), 2102212464  }
   0x7   : > { %v319_v21 = vmov (!%p87_p2), 920167782   ;;  %v320_v28 = vmov (!%p87_p2), 1326507024  }
   0xd   : > { %s379_s7 = smov (!%p104_p3, %s272_s7), 1 }
   0xe   : > { %s277_s8 = sshll.u32 %s379_s7, 3 }
   0xf   : > { %s107_s11 = scalar_lea.vmem %s376_s0, %s277_s8  ;;  %s111_s14 = scalar_lea.vmem %s377_s1, %s277_s8 }
  0x10   : > { %v112_v0 = vld [vmem:[%s107_s11] sm:$0xff] }
  0x11   : > { %v347_v1 = vmul.f32 30.0, %v112_v0 }
  0x13   : > { %v117_v2 = vand.u32 2139095040, %v347_v1  ;;  %v114_v4 = vand.u32 2147483647, %v347_v1  ;;  %vm116_vm7 = vcmp.lt.s32.totalorder %v347_v1, 0  ;;  %vm206_vm12 = vweird.f32 %v347_v1 }
  0x15   : > { %v118_v3 = vshrl.u32 %v117_v2, 23  ;;  %v121_v7 = vand.u32 8388607, %v114_v4  ;;  %vm115_vm8 = vcmp.le.f32.partialorder %v114_v4, 0.7853982 }
  0x17   : > { %v279_v5 = vadd.s32 4294967169, %v118_v3  ;;  %v122_v10 = vor.u32 8388608, %v121_v7 }
  0x19   : > { %v124_v6 = vadd.s32 1, %v279_v5  ;;  %v162_v30 = vshll.u32 %v122_v10, 8 }
  0x1b   : > { %vm125_vm0 = vcmp.gt.s32.totalorder %v124_v6, 0 }
  0x1c   : > { %v126_v8 = vsel %vm125_vm0, %v124_v6, 0 }
  0x1d   : > { %v128_v9 = vand.u32 31, %v126_v8  ;;  %v127_v11 = vshrl.u32 %v126_v8, 5 }
  0x1f   : > { %v129_v12 = vsub.s32 32, %v128_v9  ;;  %v131_v14 = vshll.u32 %v315_v13, %v128_v9  ;;  %v134_v16 = vshll.u32 %v316_v15, %v128_v9  ;;  %v137_v18 = vshll.u32 %v317_v17, %v128_v9 }
  0x20   : > { %v140_v20 = vshll.u32 %v318_v19, %v128_v9  ;;  %v143_v22 = vshll.u32 %v319_v21, %v128_v9  ;;  %vm146_vm1 = vcmp.lt.s32.totalorder %v127_v11, 1  ;;  %vm149_vm2 = vcmp.lt.s32.totalorder %v127_v11, 4 }
  0x21   : > { %v130_v23 = vshrl.u32 %v315_v13, %v129_v12  ;;  %v132_v24 = vshrl.u32 %v316_v15, %v129_v12  ;;  %v135_v25 = vshrl.u32 %v317_v17, %v129_v12  ;;  %v138_v26 = vshrl.u32 %v318_v19, %v129_v12 }
  0x22   : > { %v141_v27 = vshrl.u32 %v319_v21, %v129_v12  ;;  %v144_v29 = vshrl.u32 %v320_v28, %v129_v12  ;;  %vm147_vm3 = vcmp.lt.s32.totalorder %v127_v11, 2  ;;  %vm148_vm4 = vcmp.lt.s32.totalorder %v127_v11, 3 }
  0x23   : > { %v133_v31 = vor.u32 %v132_v24, %v131_v14  ;;  %v136_v32 = vor.u32 %v135_v25, %v134_v16  ;;  %v139_v33 = vor.u32 %v138_v26, %v137_v18 }
  0x24   : > { %v142_v34 = vor.u32 %v141_v27, %v140_v20  ;;  %v145_v35 = vor.u32 %v144_v29, %v143_v22 }
  0x25   : > { %v150_v36 = vsel %vm146_vm1, %v130_v23, %v133_v31  ;;  %v151_v37 = vsel %vm149_vm2, %v139_v33, 2102212464  ;;  %v154_v38 = vsel %vm146_vm1, %v133_v31, %v136_v32  ;;  %v158_v39 = vsel %vm146_vm1, %v136_v32, %v139_v33 }
  0x26   : > { %v152_v40 = vsel %vm148_vm4, %v136_v32, %v151_v37  ;;  %v155_v41 = vsel %vm149_vm2, %v142_v34, 920167782  ;;  %v159_v42 = vsel %vm149_vm2, %v145_v35, 1326507024 }
  0x27   : > { %v156_v43 = vsel %vm148_vm4, %v139_v33, %v155_v41  ;;  %v160_v44 = vsel %vm148_vm4, %v142_v34, %v159_v42  ;;  %v153_v45 = vsel %vm147_vm3, %v150_v36, %v152_v40 }
  0x28   : > { %v157_v46 = vsel %vm147_vm3, %v154_v38, %v156_v43  ;;  %v161_v47 = vsel %vm147_vm3, %v158_v39, %v160_v44  ;;  %v169_v52 = vmul.u32 %v162_v30, %v153_v45 }
  0x29   : > { %v353_v48 = vmul.u32.u64.low %v162_v30, %v161_v47  ;;  %v354_v49 = vmul.u32.u64.high %v162_v30, %v161_v47, %v353_v48  ;;  %v356_v50 = vmul.u32.u64.low %v162_v30, %v157_v46  ;;  %v357_v51 = vmul.u32.u64.high %v162_v30, %v157_v46, %v356_v50 }
  0x2b   : > { %vm171_vm5 = vc.u32 %v354_v49, %v356_v50  ;;  %v172_v53 = vadd.s32 1, %v357_v51  ;;  %v170_v0 = vadd.s32 %v356_v50, %v354_v49 }
  0x2d   : > { %v173_v54 = vsel %vm171_vm5, %v172_v53, %v357_v51 }
  0x2e   : > { %v174_v55 = vadd.s32 %v173_v54, %v169_v52 }
  0x30   : > { %v175_v56 = vadd.s32 536870912, %v174_v55 }
  0x32   : > { %v176_v57 = vshrl.u32 %v175_v56, 30 }
  0x34   : > { %v177_v58 = vshll.u32 %v176_v57, 30  ;;  %v200_v14 = vsub.s32 4, %v176_v57 }
  0x36   : > { %v178_v59 = vsub.s32 %v174_v55, %v177_v58  ;;  %v201_v17 = vsel %vm116_vm7, %v200_v14, %v176_v57 }
  0x37   : > { %v203_v20 = vsel %vm115_vm8, 0, %v201_v17 }
  0x38   : > { %v180_v60 = vsub.s32 0, %v178_v59  ;;  %v207_v21 = vadd.s32 3, %v203_v20 }
  0x3a   : > { %v280_v61 = vmin.u32 %v180_v60, %v178_v59  ;;  %v208_v22 = vand.u32 3, %v207_v21 }
  0x3c   : > { %v182_v62 = vclz %v280_v61  ;;  %vm213_vm9 = vcmp.eq.s32.totalorder %v208_v22, 2  ;;  %vm210_vm10 = vcmp.eq.s32.totalorder %v208_v22, 0  ;;  %vm209_vm11 = vcmp.lt.s32.totalorder %v208_v22, 2 }
  0x3e   : > { %v281_v63 = vadd.s32 4294967294, %v182_v62 }
  0x40   : > { %vm282_vm6 = vcmp.lt.s32.totalorder %v281_v63, 0 }
  0x41   : > { %v185_v2 = vsel %vm282_vm6, 0, %v281_v63 }
  0x42   : > { %v186_v3 = vsub.s32 32, %v185_v2  ;;  %v187_v5 = vshll.u32 %v178_v59, %v185_v2  ;;  %v190_v6 = vsub.s32 4294967266, %v185_v2 }
  0x44   : > { %v188_v7 = vshrl.u32 %v170_v0, %v186_v3  ;;  %v191_v8 = vadd.s32 127, %v190_v6 }
  0x46   : > { %v189_v9 = vor.u32 %v188_v7, %v187_v5  ;;  %v192_v10 = vshll.u32 %v191_v8, 23 }
  0x48   : > { %v193_v11 = vor.u32 4788187, %v192_v10  ;;  %v196_v12 = vcvt.s32.f32 %v189_v9 }
  0x4a   : > { %v194_v13 = vand.u32 2147483647, %v193_v11 }
  0x4c   : > { %v197_v15 = vmul.f32 %v196_v12, %v194_v13 }
  0x4e   : > { %v198_v16 = vxor.u32 2147483648, %v197_v15 }
  0x50   : > { %v199_v18 = vsel %vm116_vm7, %v198_v16, %v197_v15 }
  0x51   : > { %v202_v19 = vsel %vm115_vm8, %v347_v1, %v199_v18 }
  0x52   : > { %303 = vcosq.f32 %v202_v19 }
  0x53   : > { %305 = vsinq.f32 %v202_v19 }
  0x5c   : > { %v304_v23 = vpop.eup %303 }
  0x5d   : > { %v306_v24 = vpop.eup %305  ;;  %v214_v25 = vxor.u32 2147483648, %v304_v23 }
  0x5e   : > { %v211_v26 = vxor.u32 2147483648, %v306_v24 }
  0x5f   : > { %v215_v4 = vsel %vm213_vm9, %v214_v25, %v306_v24 }
  0x60   : > { %v212_v27 = vsel %vm210_vm10, %v304_v23, %v211_v26 }
  0x61   : > { %v216_v28 = vsel %vm209_vm11, %v212_v27, %v215_v4 }
  0x62   : > { %v217_v29 = vsel %vm206_vm12, nan, %v216_v28 }
  0x63   : > { %218 = vst [vmem:[%s111_s14] sm:$0xff] %v217_v29 }
  0x64 PF: > { %s11_s6 = sadd.s32 1, %s313_s6  }
  0x65   : > { %p8_p4 = scmp.ge.s32.totalorder %s11_s6, 4  }
  0x67   :  { %10 = sbr.rel (!%p8_p4) target bundleno = 1 (0x1), region = 54 }

</bundles_post_ra>
